<compile_context>
chip_gen: v5e
topology: v5e:2x2
jax: 0.10.0
libtpu: 0.0.40
codegen_flags: <defaults>
</compile_context>

<pallas_src>
import jax
import jax.numpy as jnp
from jax.experimental import pallas as pl
from jax.experimental.pallas import tpu as pltpu

# ----- real (PyTorch) dimensions ------------------------------------------
D_IN, H1, H2, D_OUT = 7, 4, 2, 2
# ----- padded (TPU-friendly) dimensions -----------------------------------
IN_PAD = 8      # x lanes inside the kernel: 7 -> 8 (aligned K for the MXU)
HID_PAD = 8     # hidden lanes: 4 / 2 -> 8 (vs. 128 before => 16x smaller intermediates)
SUB = 8         # sublane multiple for the batch axis
TB_MAX = 4096   # batch-tile cap: >= 2 parallel grid steps for large B (v7x megacore)
                # while per-step MXU work (~1us) >> ~0.35us per-step pipeline overhead.


def _pad2(a, rows, cols, dtype):
    out = jnp.zeros((rows, cols), dtype=jnp.float32)
    out = out.at[: a.shape[0], : a.shape[1]].set(a.astype(jnp.float32))
    return out.astype(dtype)


def prepare_params(params):
    """One-time prep: transpose PyTorch (out,in) weights to (in,out), zero-pad to
    MXU-friendly shapes, and cast weights to bf16 (biases stay f32: they are added to
    the f32 accumulator).  Call once at param-load time."""
    return {
        "w1": _pad2(params["w1"].T, IN_PAD, HID_PAD, jnp.bfloat16),    # (8, 8)
        "b1": _pad2(params["b1"][None, :], 1, HID_PAD, jnp.float32),   # (1, 8)
        "w2": _pad2(params["w2"].T, HID_PAD, HID_PAD, jnp.bfloat16),   # (8, 8)
        "b2": _pad2(params["b2"][None, :], 1, HID_PAD, jnp.float32),   # (1, 8)
        "w3": _pad2(params["w3"].T, HID_PAD, HID_PAD, jnp.bfloat16),   # (8, 8)
        "b3": _pad2(params["b3"][None, :], 1, D_OUT, jnp.float32),     # (1, 2)
    }


def mlp_kernel(x_ref, w1_ref, b1_ref, w2_ref, b2_ref, w3_ref, b3_ref, o_ref, xpad_ref):
    # Widen 7 -> 8 feature lanes in VMEM (pad lane explicitly zeroed) so every MXU
    # contraction uses an 8-aligned K.  This replaces the old host-side pad pass.
    xpad_ref[:, :D_IN] = x_ref[...]
    xpad_ref[:, D_IN:] = jnp.zeros(
        (xpad_ref.shape[0], IN_PAD - D_IN), xpad_ref.dtype)

    # Three back-to-back MXU matmuls (bf16 operands, explicit f32 accumulation) with
    # f32 bias + ReLU on the VPU in between.  All intermediates are only (tb, 8).
    x = xpad_ref[...].astype(jnp.bfloat16)                               # (tb, 8)
    h = jnp.dot(x, w1_ref[...], preferred_element_type=jnp.float32)      # (tb, 8) f32
    h = jnp.maximum(h + b1_ref[...], 0.0).astype(jnp.bfloat16)
    h = jnp.dot(h, w2_ref[...], preferred_element_type=jnp.float32)      # (tb, 8) f32
    h = jnp.maximum(h + b2_ref[...], 0.0).astype(jnp.bfloat16)
    y = jnp.dot(h, w3_ref[...], preferred_element_type=jnp.float32)      # (tb, 8) f32
    o_ref[...] = y[:, :D_OUT] + b3_ref[...]                              # (tb, 2)


def _forward_impl(x, pp, tb):
    """x: (B, 7) float32.  pp: prepared (padded/bf16) params.  tb: static batch tile."""
    B = x.shape[0]
    n_steps = pl.cdiv(B, tb)   # last block may be partial; OOB rows are masked away
    const = lambda shape: pl.BlockSpec(shape, lambda i: (0, 0))

    return pl.pallas_call(
        mlp_kernel,
        out_shape=jax.ShapeDtypeStruct((B, D_OUT), jnp.float32),
        grid_spec=pltpu.PrefetchScalarGridSpec(
            num_scalar_prefetch=0,
            grid=(n_steps,),
            in_specs=[
                pl.BlockSpec((tb, D_IN), lambda i: (i, 0)),   # x, batch-tiled, unpadded
                const((IN_PAD, HID_PAD)),                     # w1  (VMEM-resident)
                const((1, HID_PAD)),                          # b1
                const((HID_PAD, HID_PAD)),                    # w2
                const((1, HID_PAD)),                          # b2
                const((HID_PAD, HID_PAD)),                    # w3
                const((1, D_OUT)),                            # b3
            ],
            out_specs=pl.BlockSpec((tb, D_OUT), lambda i: (i, 0)),
            scratch_shapes=[pltpu.VMEM((tb, IN_PAD), jnp.float32)],
        ),
        compiler_params=pltpu.CompilerParams(
            dimension_semantics=("parallel",),        # v7x: 2 TCs split the batch grid
            vmem_limit_bytes=32 * 1024 * 1024,        # generous; per-step use ~0.5 MiB
        ),
    )(x, pp["w1"], pp["b1"], pp["w2"], pp["b2"], pp["w3"], pp["b3"])


_forward_jit = jax.jit(_forward_impl, static_argnums=(2,))


def net_7_2_forward(x, prepared_params):
    """Forward pass. x: (B, 7); prepared_params from prepare_params()."""
    B = x.shape[0]
    b8 = max(SUB, ((B + SUB - 1) // SUB) * SUB)
    # Bucket the tile to a power of two (bounded number of Mosaic variants) and cap it.
    # Note: distinct B still implies a distinct XLA program (inherent to JAX); serving
    # paths with varying batch sizes should bucket B upstream to these same sizes.
    tb = min(TB_MAX, 1 << (b8 - 1).bit_length())
    return _forward_jit(x.astype(jnp.float32), prepared_params, tb)


def _init_params(key):
    """Deterministic synthetic parameters with PyTorch nn.Linear (out,in) shapes."""
    ks = jax.random.split(key, 6)
    scale = 0.5
    return {
        "w1": scale * jax.random.normal(ks[0], (H1, D_IN), jnp.float32),
        "b1": scale * jax.random.normal(ks[1], (H1,), jnp.float32),
        "w2": scale * jax.random.normal(ks[2], (H2, H1), jnp.float32),
        "b2": scale * jax.random.normal(ks[3], (H2,), jnp.float32),
        "w3": scale * jax.random.normal(ks[4], (D_OUT, H2), jnp.float32),
        "b3": scale * jax.random.normal(ks[5], (D_OUT,), jnp.float32),
    }


def _reference(x, p):
    h1 = jnp.maximum(x @ p["w1"].T + p["b1"], 0.0)
    h2 = jnp.maximum(h1 @ p["w2"].T + p["b2"], 0.0)
    return h2 @ p["w3"].T + p["b3"]


if __name__ == "__main__":
    key = jax.random.PRNGKey(0)
    kx, kp = jax.random.split(key)

    B = 8
    x = jax.random.normal(kx, (B, D_IN), jnp.float32)
    params = _init_params(kp)
    prepared = prepare_params(params)   # one-time transpose + pad + bf16 cast

    y = jax.block_until_ready(net_7_2_forward(x, prepared))
    y_ref = _reference(x, params)
    assert y.shape == (B, D_OUT), y.shape
    # bf16 matmul operands (f32 accumulation) -> compare against the f32 reference with
    # a tolerance comfortably above bf16 rounding yet far below the signal magnitude.
    assert jnp.allclose(y, y_ref, atol=5e-2, rtol=5e-2), (
        f"max err {jnp.max(jnp.abs(y - y_ref))}")

    # Multi-tile batch: grid > 1, partial (masked) last block, no host-side padding.
    B2 = 5000
    x2 = jax.random.normal(jax.random.PRNGKey(1), (B2, D_IN), jnp.float32)
    y2 = jax.block_until_ready(net_7_2_forward(x2, prepared))
    y2_ref = _reference(x2, params)
    assert y2.shape == (B2, D_OUT), y2.shape
    assert jnp.allclose(y2, y2_ref, atol=5e-2, rtol=5e-2), (
        f"max err {jnp.max(jnp.abs(y2 - y2_ref))}")

    print("KERNEL_OK")
</pallas_src>

<mosaic_0001>
module attributes {stable_mosaic.version = 11 : i64} {
  func.func @mlp_kernel(%arg0: i32, %arg1: memref<8x7xf32, #tpu.memory_space<vmem>>, %arg2: memref<8x8xbf16, #tpu.memory_space<vmem>>, %arg3: memref<1x8xf32, #tpu.memory_space<vmem>>, %arg4: memref<8x8xbf16, #tpu.memory_space<vmem>>, %arg5: memref<1x8xf32, #tpu.memory_space<vmem>>, %arg6: memref<8x8xbf16, #tpu.memory_space<vmem>>, %arg7: memref<1x2xf32, #tpu.memory_space<vmem>>, %arg8: memref<8x2xf32, #tpu.memory_space<vmem>>, %arg9: memref<8x8xf32, #tpu.memory_space<vmem>>) attributes {dimension_semantics = [#tpu.dimension_semantics<parallel>], iteration_bounds = array<i64: 1>, scalar_prefetch = 0 : i64, scratch_operands = 1 : i64, tpu.core_type = #tpu.core_type<tc>, window_params = [{transform_indices = @transform_0, window_bounds = array<i64: 8, 7>}, {pipeline_mode = #tpu.pipeline_mode<synchronous>, transform_indices = @transform_1, window_bounds = array<i64: 8, 8>}, {pipeline_mode = #tpu.pipeline_mode<synchronous>, transform_indices = @transform_2, window_bounds = array<i64: 1, 8>}, {pipeline_mode = #tpu.pipeline_mode<synchronous>, transform_indices = @transform_3, window_bounds = array<i64: 8, 8>}, {pipeline_mode = #tpu.pipeline_mode<synchronous>, transform_indices = @transform_4, window_bounds = array<i64: 1, 8>}, {pipeline_mode = #tpu.pipeline_mode<synchronous>, transform_indices = @transform_5, window_bounds = array<i64: 8, 8>}, {pipeline_mode = #tpu.pipeline_mode<synchronous>, transform_indices = @transform_6, window_bounds = array<i64: 1, 2>}, {transform_indices = @transform_7, window_bounds = array<i64: 8, 2>}]} {
    %c0 = arith.constant 0 : index
    %c0_0 = arith.constant 0 : index
    %0 = vector.load %arg1[%c0, %c0_0] : memref<8x7xf32, #tpu.memory_space<vmem>>, vector<8x7xf32>
    %c0_1 = arith.constant 0 : index
    %c0_2 = arith.constant 0 : index
    %1 = vector.load %arg9[%c0_1, %c0_2] : memref<8x8xf32, #tpu.memory_space<vmem>>, vector<8x7xf32>
    tpu.vector_store %arg9[%c0_1, %c0_2], %0 {strides = array<i32>} : memref<8x8xf32, #tpu.memory_space<vmem>>, vector<8x7xf32>,
    %cst = arith.constant 0.000000e+00 : f32
    %2 = vector.broadcast %cst : f32 to vector<8x1xf32>
    %c0_3 = arith.constant 0 : index
    %c7 = arith.constant 7 : index
    %3 = vector.load %arg9[%c0_3, %c7] : memref<8x8xf32, #tpu.memory_space<vmem>>, vector<8x1xf32>
    tpu.vector_store %arg9[%c0_3, %c7], %2 {strides = array<i32>} : memref<8x8xf32, #tpu.memory_space<vmem>>, vector<8x1xf32>,
    %c0_4 = arith.constant 0 : index
    %c0_5 = arith.constant 0 : index
    %4 = vector.load %arg9[%c0_4, %c0_5] : memref<8x8xf32, #tpu.memory_space<vmem>>, vector<8x8xf32>
    %5 = arith.truncf %4 : vector<8x8xf32> to vector<8x8xbf16>
    %c0_6 = arith.constant 0 : index
    %c0_7 = arith.constant 0 : index
    %6 = vector.load %arg2[%c0_6, %c0_7] : memref<8x8xbf16, #tpu.memory_space<vmem>>, vector<8x8xbf16>
    %cst_8 = arith.constant dense<0.000000e+00> : vector<8x8xf32>
    %7 = tpu.matmul %5, %6, %cst_8 {dimension_numbers = #tpu.dot_dimension_numbers<[1], [0], [0], [1], [0, 0, 1, 1], [], []>} : vector<8x8xbf16>, vector<8x8xbf16>, vector<8x8xf32> -> vector<8x8xf32>
    %c0_9 = arith.constant 0 : index
    %c0_10 = arith.constant 0 : index
    %8 = vector.load %arg3[%c0_9, %c0_10] : memref<1x8xf32, #tpu.memory_space<vmem>>, vector<1x8xf32>
    %9 = vector.broadcast %8 : vector<1x8xf32> to vector<8x8xf32>
    %10 = arith.addf %7, %9 : vector<8x8xf32>
    %cst_11 = arith.constant 0.000000e+00 : f32
    %11 = vector.broadcast %cst_11 : f32 to vector<8x8xf32>
    %12 = arith.maximumf %10, %11 : vector<8x8xf32>
    %13 = arith.truncf %12 : vector<8x8xf32> to vector<8x8xbf16>
    %c0_12 = arith.constant 0 : index
    %c0_13 = arith.constant 0 : index
    %14 = vector.load %arg4[%c0_12, %c0_13] : memref<8x8xbf16, #tpu.memory_space<vmem>>, vector<8x8xbf16>
    %cst_14 = arith.constant dense<0.000000e+00> : vector<8x8xf32>
    %15 = tpu.matmul %13, %14, %cst_14 {dimension_numbers = #tpu.dot_dimension_numbers<[1], [0], [0], [1], [0, 0, 1, 1], [], []>} : vector<8x8xbf16>, vector<8x8xbf16>, vector<8x8xf32> -> vector<8x8xf32>
    %c0_15 = arith.constant 0 : index
    %c0_16 = arith.constant 0 : index
    %16 = vector.load %arg5[%c0_15, %c0_16] : memref<1x8xf32, #tpu.memory_space<vmem>>, vector<1x8xf32>
    %17 = vector.broadcast %16 : vector<1x8xf32> to vector<8x8xf32>
    %18 = arith.addf %15, %17 : vector<8x8xf32>
    %cst_17 = arith.constant 0.000000e+00 : f32
    %19 = vector.broadcast %cst_17 : f32 to vector<8x8xf32>
    %20 = arith.maximumf %18, %19 : vector<8x8xf32>
    %21 = arith.truncf %20 : vector<8x8xf32> to vector<8x8xbf16>
    %c0_18 = arith.constant 0 : index
    %c0_19 = arith.constant 0 : index
    %22 = vector.load %arg6[%c0_18, %c0_19] : memref<8x8xbf16, #tpu.memory_space<vmem>>, vector<8x8xbf16>
    %cst_20 = arith.constant dense<0.000000e+00> : vector<8x8xf32>
    %23 = tpu.matmul %21, %22, %cst_20 {dimension_numbers = #tpu.dot_dimension_numbers<[1], [0], [0], [1], [0, 0, 1, 1], [], []>} : vector<8x8xbf16>, vector<8x8xbf16>, vector<8x8xf32> -> vector<8x8xf32>
    %24 = vector.extract_strided_slice %23 {offsets = [0, 0], sizes = [8, 2], strides = [1, 1]} : vector<8x8xf32> to vector<8x2xf32>
    %c0_21 = arith.constant 0 : index
    %c0_22 = arith.constant 0 : index
    %25 = vector.load %arg7[%c0_21, %c0_22] : memref<1x2xf32, #tpu.memory_space<vmem>>, vector<1x2xf32>
    %26 = vector.broadcast %25 : vector<1x2xf32> to vector<8x2xf32>
    %27 = arith.addf %24, %26 : vector<8x2xf32>
    %c0_23 = arith.constant 0 : index
    %c0_24 = arith.constant 0 : index
    %28 = vector.load %arg8[%c0_23, %c0_24] : memref<8x2xf32, #tpu.memory_space<vmem>>, vector<8x2xf32>
    tpu.vector_store %arg8[%c0_23, %c0_24], %27 {strides = array<i32>} : memref<8x2xf32, #tpu.memory_space<vmem>>, vector<8x2xf32>,
    return
  }
  func.func @transform_0(%arg0: i32) -> (i32, i32) {
    %c0_i32 = arith.constant 0 : i32
    %c0_i32_0 = arith.constant 0 : i32
    return %arg0, %c0_i32 : i32, i32
  }
  func.func @transform_1(%arg0: i32) -> (i32, i32) {
    %c0_i32 = arith.constant 0 : i32
    %c0_i32_0 = arith.constant 0 : i32
    %c0_i32_1 = arith.constant 0 : i32
    return %c0_i32, %c0_i32_0 : i32, i32
  }
  func.func @transform_2(%arg0: i32) -> (i32, i32) {
    %c0_i32 = arith.constant 0 : i32
    %c0_i32_0 = arith.constant 0 : i32
    %c0_i32_1 = arith.constant 0 : i32
    return %c0_i32, %c0_i32_0 : i32, i32
  }
  func.func @transform_3(%arg0: i32) -> (i32, i32) {
    %c0_i32 = arith.constant 0 : i32
    %c0_i32_0 = arith.constant 0 : i32
    %c0_i32_1 = arith.constant 0 : i32
    return %c0_i32, %c0_i32_0 : i32, i32
  }
  func.func @transform_4(%arg0: i32) -> (i32, i32) {
    %c0_i32 = arith.constant 0 : i32
    %c0_i32_0 = arith.constant 0 : i32
    %c0_i32_1 = arith.constant 0 : i32
    return %c0_i32, %c0_i32_0 : i32, i32
  }
  func.func @transform_5(%arg0: i32) -> (i32, i32) {
    %c0_i32 = arith.constant 0 : i32
    %c0_i32_0 = arith.constant 0 : i32
    %c0_i32_1 = arith.constant 0 : i32
    return %c0_i32, %c0_i32_0 : i32, i32
  }
  func.func @transform_6(%arg0: i32) -> (i32, i32) {
    %c0_i32 = arith.constant 0 : i32
    %c0_i32_0 = arith.constant 0 : i32
    %c0_i32_1 = arith.constant 0 : i32
    return %c0_i32, %c0_i32_0 : i32, i32
  }
  func.func @transform_7(%arg0: i32) -> (i32, i32) {
    %c0_i32 = arith.constant 0 : i32
    %c0_i32_0 = arith.constant 0 : i32
    return %arg0, %c0_i32 : i32, i32
  }
}

</mosaic_0001>

<bundles_post_ra>
// kernel: _forward_impl.1
= control target key start
LH: loop header
LB: loop body
LE: loop exit
PB: predicated region body
PF: predicated region fallthrough
CT: control target
= control target key end

     0   :  { %12 = vsyncpa [#allocation4], 0  ;;  %s447_s0 = inlined_call_operand.hbm [shape: f32[8,7], index: 0, kind: input, shape index: {}]   ;;  %s448_s1 = inlined_call_operand.hbm [shape: bf16[8,8], index: 1, kind: input, shape index: {}]   ;;  %s449_s2 = inlined_call_operand.hbm [shape: f32[1,8], index: 2, kind: input, shape index: {}]   ;;  %s450_s3 = inlined_call_operand.vmem [shape: bf16[8,8], index: 3, kind: input, shape index: {}]   ;;  %s451_s4 = inlined_call_operand.hbm [shape: f32[1,8], index: 4, kind: input, shape index: {}]   ;;  %s452_s5 = inlined_call_operand.hbm [shape: bf16[8,8], index: 5, kind: input, shape index: {}]   ;;  %s453_s6 = inlined_call_operand.hbm [shape: f32[1,2], index: 6, kind: input, shape index: {}]   ;;  %s454_s7 = inlined_call_operand.vmem [shape: f32[8,2], index: 7, kind: output, shape index: {}]  }
   0x1   :  { %13 = vsyncpa [#allocation6], 0 }
   0x2   :  { %14 = vsyncpa [#allocation9], 0  ;;  %s32_s26 = sshll.u32 %s448_s1, 4  ;;  %s33_s26 = int_to_ptr.hbm [resolvable:$true] %s32_s26 }
   0x3   :  { %15 = vsyncpa [#allocation12], 0  ;;  %s370_s27 = smov [#allocation5]   ;;  %s56_s8 = sshll.u32 %s451_s4, 4  ;;  %s57_s8 = int_to_ptr.hbm [resolvable:$true] %s56_s8 }
   0x4   :  { %s34_s28 = sshll.u32 %s370_s27, 4  ;;  %s371_s9 = smov [#allocation8]   ;;  %s35_s28 = int_to_ptr.vmem [resolvable:$true] %s34_s28 }
   0x5   :  { %37 = dma.hbm_to_vmem [thread:$0]  %s33_s26, 64, %s35_s28, [#allocation6]  }
   0x6   :  { %s58_s10 = sshll.u32 %s371_s9, 4  ;;  %s21_s13 = sshll.u32 %s447_s0, 4  ;;  %s59_s10 = int_to_ptr.vmem [resolvable:$true] %s58_s10  ;;  %s22_s13 = int_to_ptr.hbm [resolvable:$true] %s21_s13 }
   0x7   :  { %61 = dma.hbm_to_vmem [thread:$0]  %s57_s8, 16, %s59_s10, [#allocation9]  }
   0x8   :  { %s43_s15 = sshll.u32 %s449_s2, 4  ;;  %s372_s16 = smov [#allocation3]   ;;  %s44_s15 = int_to_ptr.hbm [resolvable:$true] %s43_s15 }
   0x9   :  { %s23_s17 = sshll.u32 %s372_s16, 4  ;;  %s373_s4 = smov [#allocation7]   ;;  %s24_s17 = int_to_ptr.vmem [resolvable:$true] %s23_s17 }
   0xa   :  { %26 = dma.hbm_to_vmem [thread:$0]  %s22_s13, 128, %s24_s17, [#allocation4]  }
   0xb   :  { %s45_s18 = sshll.u32 %s373_s4, 4  ;;  %s67_s21 = sshll.u32 %s452_s5, 4  ;;  %s46_s18 = int_to_ptr.vmem [resolvable:$true] %s45_s18  ;;  %s68_s21 = int_to_ptr.hbm [resolvable:$true] %s67_s21 }
   0xc   :  { %48 = dma.hbm_to_vmem [thread:$0]  %s44_s15, 16, %s46_s18, [#allocation6]  }
   0xd   :  { %s78_s23 = sshll.u32 %s453_s6, 4  ;;  %s374_s24 = smov [#allocation10]   ;;  %s79_s23 = int_to_ptr.hbm [resolvable:$true] %s78_s23 }
   0xe   :  { %s69_s2 = sshll.u32 %s374_s24, 4  ;;  %s375_s25 = smov [#allocation11]   ;;  %s70_s2 = int_to_ptr.vmem [resolvable:$true] %s69_s2 }
   0xf   :  { %72 = dma.hbm_to_vmem [thread:$0]  %s68_s21, 64, %s70_s2, [#allocation9]  }
  0x10   :  { %s80_s26 = sshll.u32 %s375_s25, 4  ;;  %s81_s26 = int_to_ptr.vmem [resolvable:$true] %s80_s26 }
  0x11   :  { %83 = dma.hbm_to_vmem [thread:$0]  %s79_s23, 16, %s81_s26, [#allocation12]  }
  0x12   :  { %362 = dma.done.wait [#allocation4], 128  }
  0x13   :  { %363 = vsyncadd [#allocation4], 4294967168 }
  0x14   :  { %364 = dma.done.wait [#allocation6], 80  }
  0x15   :  { %365 = vsyncadd [#allocation6], 4294967216 }
  0x16   :  { %366 = dma.done.wait [#allocation9], 80  }
  0x17   :  { %367 = vsyncadd [#allocation9], 4294967216 }
  0x18   :  { %368 = dma.done.wait [#allocation12], 16  }
  0x19   :  { %369 = vsyncadd [#allocation12], 4294967280  ;;  %vm110_vm0 = vcmask 56320   ;;  %vm125_vm1 = vcmask 1043456   ;;  %vm112_vm2 = vcmask 64568   ;;  %v109_v0 = vld [vmem:[#allocation3] sm:$0xff] }
  0x1a   :  { %v116_v1 = vld [vmem:[#allocation5] sm:$0xf]  ;;  %111 = vst.msk [vmem:[#allocation2] sm:$0xff] %vm110_vm0, %v109_v0  ;;  %v376_v3 = vmov 0.0   ;;  %vm121_vm3 = vcmask 64512   ;;  %vm195_vm4 = vcmask 15360  }
  0x1b   :  { %v127_v2 = vsel %vm125_vm1, %v116_v1, 0  ;;  %113 = vst.msk [vmem:[#allocation2] sm:$0xff] %vm112_vm2, %v376_v3  ;;  %v144_v6 = vld [vmem:[%s450_s3] sm:$0xf]  ;;  %v215_v8 = vld [vmem:[#allocation7] ss:$0 sm:$0xff] }
  0x1c   :  { %136 = vmatpush.bf16.msra.mxu0 %v127_v2  ;;  %v153_v7 = vsel %vm125_vm1, %v144_v6, 0  ;;  %v170_v14 = vld [vmem:[#allocation10] sm:$0xf]  ;;  %v216_v16 = vld [vmem:[#allocation8] ss:$0 sm:$0xff] }
  0x1d   :  { %162 = vmatpush.bf16.msra.mxu1 %v153_v7  ;;  %v175_v15 = vsel %vm125_vm1, %v170_v14, 0  ;;  %v217_v22 = vld [vmem:[#allocation11] ss:$0 sm:$0xff] }
  0x1e   :  { %184 = vmatpush.bf16.msra.mxu2 %v175_v15 }
  0x22   :  { %v114_v4 = vld [vmem:[#allocation2] sm:$0xff] }
  0x23   :  { %v115_v5 = vpack.c.bf16 %v114_v4, %v114_v4 }
  0x25   :  { %205 = vmatmul.msk.bf16.vlgmr.msra.gmra.mxu0 %vm121_vm3, %v115_v5 }
  0xa2   :  { %v138_v9 = vpop.f32.mrf.mxu0 }
  0xa3   :  { %v139_v10 = vadd.f32 %v215_v8, %v138_v9 }
  0xa5   :  { %v142_v11 = vmax.f32 %v139_v10, 0.0 }
  0xa7   :  { %v143_v12 = vpack.c.bf16 %v142_v11, %v142_v11 }
  0xa9   :  { %206 = vmatmul.msk.bf16.vlgmr.msra.gmra.mxu1 %vm121_vm3, %v143_v12 }
  0xaa   :  { %v140_v13 = vpop.f32.mrf.mxu0 }
 0x126   :  { %v164_v17 = vpop.f32.mrf.mxu1 }
 0x127   :  { %v165_v18 = vadd.f32 %v216_v16, %v164_v17 }
 0x129   :  { %v168_v19 = vmax.f32 %v165_v18, 0.0 }
 0x12b   :  { %v169_v20 = vpack.c.bf16 %v168_v19, %v168_v19 }
 0x12d   :  { %207 = vmatmul.msk.bf16.vlgmr.msra.gmra.mxu2 %vm121_vm3, %v169_v20 }
 0x12e   :  { %v166_v21 = vpop.f32.mrf.mxu1 }
 0x1b0   :  { %v186_v23 = vpop.f32.mrf.mxu2 }
 0x1b1   :  { %v194_v24 = vadd.f32 %v217_v22, %v186_v23 }
 0x1b3   :  { %196 = vst.msk [vmem:[%s454_s7] sm:$0xff] %vm195_vm4, %v194_v24 }
 0x1b8   :  { %v188_v25 = vpop.f32.mrf.mxu2 }
 0x1b9   :  { %201 = vsyncpa [#allocation4], 1 }
 0x1ba   :  { %202 = vsyncpa [#allocation6], 1 }
 0x1bb   :  { %203 = vsyncpa [#allocation9], 1 }
 0x1bc   :  { %204 = vsyncpa [#allocation12], 1 }

</bundles_post_ra>
